<compile_context>
chip_gen: v5e
topology: v5e:2x2
jax: 0.10.0
libtpu: 0.0.40
codegen_flags: <defaults>
</compile_context>

<pallas_src>
import functools

import jax
import jax.numpy as jnp
from jax.experimental import pallas as pl
from jax.experimental.pallas import tpu as pltpu


def _sdpa_kernel(scale, compute_dtype, return_attn, lane_dense,
                 q_ref, k_ref, v_ref, mask_ref, *out_refs):
    """One grid step: block_h heads of one batch element, one block of query rows.

    q_ref    : (1, block_h, Tq, D)
    k_ref    : (1, block_h, S,  D)
    v_ref    : (1, block_h, S,  D)
    mask_ref : (1, mh, mq, mk) int8 (mh/mq/mk may be 1: broadcast in-kernel)
    out_refs : ctx_ref [(1, block_h, Tq, D) or (1, Tq, block_h*D)]
               [, attn_ref (1, block_h, Tq, S)]
    """
    ctx_ref = out_refs[0]

    # Fold 1/sqrt(d_head) into Q (Tq*D multiply, not Tq*S), then cast to the MXU
    # compute dtype (bf16 inputs -> ~2x MXU rate; f32 accumulation below).
    q = (q_ref[0].astype(jnp.float32) * scale).astype(compute_dtype)   # (bh, Tq, D)
    k = k_ref[0].astype(compute_dtype)                                  # (bh, S,  D)
    v = v_ref[0].astype(compute_dtype)                                  # (bh, S,  D)

    # scores = (Q * scale) @ K^T without materializing K^T (contract last dims).
    scores = jnp.einsum("hqd,hkd->hqk", q, k,
                        preferred_element_type=jnp.float32)             # (bh, Tq, S) f32

    # masked_fill_(attn_mask, -1e9); the un-broadcast int8 mask is broadcast here
    # over batch/head/query dims as needed (cheap VPU select).
    mask = jnp.broadcast_to(mask_ref[0] != 0, scores.shape)
    scores = jnp.where(mask, jnp.float32(-1000000000.0), scores)

    # Numerically stable softmax along the key axis.
    m = jnp.max(scores, axis=-1, keepdims=True)
    e = jnp.exp(scores - m)
    denom = jnp.sum(e, axis=-1, keepdims=True)

    if return_attn:
        attn_ref = out_refs[1]
        # NOTE: approx reciprocal -> rows sum to 1 within ~2^-12 (bf16-level).
        attn = e * pl.reciprocal(denom, approx=True)                    # (bh, Tq, S)
        attn_ref[0] = attn.astype(attn_ref.dtype)
        ctx = jnp.einsum("hqk,hkd->hqd", attn.astype(compute_dtype), v,
                         preferred_element_type=jnp.float32)            # (bh, Tq, D)
    else:
        # Deferred normalization: (e @ V) * (1/denom) replaces an H*Tq*S VPU multiply
        # with an H*Tq*D one. e <= 1 after max-subtraction, so the bf16 cast is safe.
        ctx = jnp.einsum("hqk,hkd->hqd", e.astype(compute_dtype), v,
                         preferred_element_type=jnp.float32)            # (bh, Tq, D)
        ctx = ctx * pl.reciprocal(denom, approx=True)

    # dropout(p=0.0) == identity
    # TODO(synk): training-mode dropout on `attn` would go here (pltpu.prng_*).

    if lane_dense:
        # (bh, Tq, D) -> (Tq, bh*D): lane-dense output block -> unmasked full-width
        # stores, and the layout the downstream output projection wants.
        bh = ctx.shape[0]
        ctx_ld = jnp.concatenate([ctx[h] for h in range(bh)], axis=-1)  # (Tq, bh*D)
        ctx_ref[0] = ctx_ld.astype(ctx_ref.dtype)
    else:
        ctx_ref[0] = ctx.astype(ctx_ref.dtype)


def _pick_block_q(S, block_h, D, qkv_bytes, ctx_bytes, attn_bytes, return_attn,
                  budget_bytes=24 << 20):
    """Largest query-block that keeps the per-step working set under budget_bytes.

    Prefers multiples of 128 (fills the MXU M dim; satisfies int8/bf16 sublane tiles),
    falling back to multiples of 8 (or S itself).  budget_bytes is kept well under
    the 48 MiB vmem_limit we request (and v5e's 16 MiB scoped default only applies
    if vmem_limit_bytes is left unset)."""
    def est(bq):
        q_in   = 2 * block_h * bq * D * qkv_bytes          # double-buffered Q tile
        kv_in  = 4 * block_h * S * D * qkv_bytes           # double-buffered full-S K+V
        mask   = 2 * bq * S                                 # int8 mask tile (upper bound)
        ctx_o  = 2 * block_h * bq * D * ctx_bytes
        attn_o = (2 * block_h * bq * S * attn_bytes) if return_attn else 0
        temp   = 2 * block_h * bq * S * 4                   # f32 scores + exp temps
        return q_in + kv_in + mask + ctx_o + attn_o + temp

    cands = [S] + [c for c in range(((S - 1) // 128) * 128, 0, -128) if S % c == 0]
    for bq in cands:
        if est(bq) <= budget_bytes:
            return bq
    for bq in range(((S - 1) // 8) * 8, 0, -8):             # fallback: multiples of 8
        if S % bq == 0 and est(bq) <= budget_bytes:
            return bq
    return min(cands)


def scaled_dot_product_attention(Q, K, V, attn_mask, d_head, *,
                                 block_q=None,
                                 block_h=None,
                                 return_attn=True,
                                 attn_dtype=jnp.bfloat16,
                                 compute_dtype=jnp.bfloat16,
                                 lane_dense_ctx=False,
                                 vmem_limit_bytes=48 << 20):
    """Q, K, V: (B, H, S, D) (f32 or bf16 — pass bf16 to halve HBM/VMEM traffic).

    attn_mask: any shape broadcastable to (B, H, S, S) (nonzero/True => masked), e.g.
    a (B, 1, 1, S) key-padding mask — it is shipped un-broadcast and expanded in-kernel.

    Returns (context, attn) like the PyTorch module; attn is None when
    return_attn=False (the fast path — skips the (B,H,S,S) HBM write and defers the
    softmax division past the second matmul).  With lane_dense_ctx=True the context
    is returned as (B, S, H*D) (the layout the output projection consumes).
    """
    B, H, S, D = Q.shape
    scale = 1.0 / (float(d_head) ** 0.5)

    # ---- head blocking --------------------------------------------------------
    if block_h is None or H % block_h != 0:
        block_h = H
    if lane_dense_ctx and block_h < H and (block_h * D) % 128 != 0:
        block_h = H                      # keep the lane-dense output block legal
    num_h_blocks = H // block_h

    # ---- query blocking -------------------------------------------------------
    qkv_bytes = jnp.dtype(Q.dtype).itemsize
    ctx_bytes = qkv_bytes
    attn_bytes = jnp.dtype(attn_dtype).itemsize
    if block_q is None:
        block_q = _pick_block_q(S, block_h, D, qkv_bytes, ctx_bytes, attn_bytes,
                                return_attn)
    if S % block_q != 0 or (block_q != S and block_q % 8 != 0):
        block_q = S
    num_q_blocks = S // block_q

    # ---- mask: ship un-broadcast, as int8 -------------------------------------
    mask = jnp.asarray(attn_mask)
    if mask.ndim == 2:                   # (B, S_k) key padding
        mask = mask[:, None, None, :]
    elif mask.ndim == 3:                 # (B, S_q, S_k)
        mask = mask[:, None, :, :]
    assert mask.ndim == 4, "attn_mask must be broadcastable to (B, H, S, S)"
    mB, mH, mQ, mK = mask.shape
    assert mB in (1, B) and mH in (1, H) and mQ in (1, S) and mK in (1, S)
    mask = mask.astype(jnp.int8)

    mask_block = (1,
                  block_h if mH == H else 1,
                  block_q if mQ == S else 1,
                  mK)

    def mask_index(b, hi, qi):
        return (b if mB == B else 0,
                hi if mH == H else 0,
                qi if mQ == S else 0,
                0)

    # ---- specs ----------------------------------------------------------------
    in_specs = [
        pl.BlockSpec((1, block_h, block_q, D), lambda b, hi, qi: (b, hi, qi, 0)),  # Q
        pl.BlockSpec((1, block_h, S, D),       lambda b, hi, qi: (b, hi, 0, 0)),   # K
        pl.BlockSpec((1, block_h, S, D),       lambda b, hi, qi: (b, hi, 0, 0)),   # V
        pl.BlockSpec(mask_block, mask_index),                                      # mask
    ]

    if lane_dense_ctx:
        ctx_shape = (B, S, H * D)
        ctx_spec = pl.BlockSpec((1, block_q, block_h * D),
                                lambda b, hi, qi: (b, qi, hi))
    else:
        ctx_shape = (B, H, S, D)
        ctx_spec = pl.BlockSpec((1, block_h, block_q, D),
                                lambda b, hi, qi: (b, hi, qi, 0))

    out_shape = [jax.ShapeDtypeStruct(ctx_shape, Q.dtype)]
    out_specs = [ctx_spec]
    if return_attn:
        out_shape.append(jax.ShapeDtypeStruct((B, H, S, S), attn_dtype))
        out_specs.append(pl.BlockSpec((1, block_h, block_q, S),
                                      lambda b, hi, qi: (b, hi, qi, 0)))

    kernel = functools.partial(_sdpa_kernel, scale, compute_dtype, return_attn,
                               lane_dense_ctx)

    outs = pl.pallas_call(
        kernel,
        out_shape=tuple(out_shape),
        grid_spec=pltpu.PrefetchScalarGridSpec(
            num_scalar_prefetch=0,
            grid=(B, num_h_blocks, num_q_blocks),
            in_specs=in_specs,
            out_specs=out_specs,
        ),
        compiler_params=pltpu.CompilerParams(
            # q-blocks sequential per core -> K/V tiles stay resident; batch/head
            # blocks shard across TensorCores (megacore / v7x).
            dimension_semantics=("parallel", "parallel", "arbitrary"),
            vmem_limit_bytes=vmem_limit_bytes),
    )(Q, K, V, mask)

    ctx = outs[0]
    attn = outs[1] if return_attn else None
    return ctx, attn


def _reference(Q, K, V, attn_mask, d_head):
    scale = 1.0 / (float(d_head) ** 0.5)
    scores = jnp.einsum("bhqd,bhkd->bhqk", Q, K) * scale
    scores = jnp.where(jnp.broadcast_to(attn_mask, scores.shape),
                       -1000000000.0, scores)
    attn = jax.nn.softmax(scores, axis=-1)
    ctx = jnp.einsum("bhqk,bhkd->bhqd", attn, V)
    return ctx, attn


if __name__ == "__main__":
    # Small config consistent with the module: batch=2, n_head=2, seq=8, d_head=32.
    B, H, S, D = 2, 2, 8, 32
    key = jax.random.PRNGKey(0)
    kq, kk, kv = jax.random.split(key, 3)

    Q = jax.random.normal(kq, (B, H, S, D), dtype=jnp.float32)
    K = jax.random.normal(kk, (B, H, S, D), dtype=jnp.float32)
    V = jax.random.normal(kv, (B, H, S, D), dtype=jnp.float32)

    # Un-broadcast key-padding mask, per-batch lengths: (B, 1, 1, S).
    lens = jnp.array([S - 2, S - 3])
    attn_mask = (jnp.arange(S)[None, :] >= lens[:, None])[:, None, None, :]

    ctx_ref, attn_ref = _reference(Q, K, V, attn_mask, d_head=D)

    # --- default path: context (B,H,S,D) + bf16 attention probabilities ---------
    ctx, attn = scaled_dot_product_attention(Q, K, V, attn_mask, d_head=D)
    jax.block_until_ready((ctx, attn))
    assert ctx.shape == (B, H, S, D) and attn.shape == (B, H, S, S)
    assert jnp.allclose(ctx, ctx_ref, atol=3e-2, rtol=3e-2), "ctx mismatch"
    assert jnp.allclose(attn.astype(jnp.float32), attn_ref,
                        atol=3e-2, rtol=3e-2), "attn mismatch"

    # --- fast path: bf16 inputs, no attn output, lane-dense (B, S, H*D) context --
    ctx_fast, attn_none = scaled_dot_product_attention(
        Q.astype(jnp.bfloat16), K.astype(jnp.bfloat16), V.astype(jnp.bfloat16),
        attn_mask, d_head=D, return_attn=False, lane_dense_ctx=True)
    jax.block_until_ready(ctx_fast)
    assert attn_none is None
    assert ctx_fast.shape == (B, S, H * D)
    ctx_ref_ld = jnp.transpose(ctx_ref, (0, 2, 1, 3)).reshape(B, S, H * D)
    assert jnp.allclose(ctx_fast.astype(jnp.float32), ctx_ref_ld,
                        atol=5e-2, rtol=5e-2), "ctx (fast path) mismatch"

    print("KERNEL_OK")
</pallas_src>

<mosaic_0001>
module attributes {stable_mosaic.version = 11 : i64} {
  func.func @_sdpa_kernel(%arg0: i32, %arg1: i32, %arg2: i32, %arg3: memref<1x2x8x32xf32, #tpu.memory_space<vmem>>, %arg4: memref<1x2x8x32xf32, #tpu.memory_space<vmem>>, %arg5: memref<1x2x8x32xf32, #tpu.memory_space<vmem>>, %arg6: memref<1x1x1x8xi8, #tpu.memory_space<vmem>>, %arg7: memref<1x2x8x32xf32, #tpu.memory_space<vmem>>, %arg8: memref<1x2x8x8xbf16, #tpu.memory_space<vmem>>) attributes {dimension_semantics = [#tpu.dimension_semantics<parallel>, #tpu.dimension_semantics<parallel>, #tpu.dimension_semantics<arbitrary>], iteration_bounds = array<i64: 2, 1, 1>, scalar_prefetch = 0 : i64, scratch_operands = 0 : i64, tpu.core_type = #tpu.core_type<tc>, window_params = [{transform_indices = @transform_0, window_bounds = array<i64: 1, 2, 8, 32>}, {transform_indices = @transform_1, window_bounds = array<i64: 1, 2, 8, 32>}, {transform_indices = @transform_2, window_bounds = array<i64: 1, 2, 8, 32>}, {transform_indices = @transform_3, window_bounds = array<i64: 1, 1, 1, 8>}, {transform_indices = @transform_4, window_bounds = array<i64: 1, 2, 8, 32>}, {transform_indices = @transform_5, window_bounds = array<i64: 1, 2, 8, 8>}]} {
    %c0 = arith.constant 0 : index
    %c0_0 = arith.constant 0 : index
    %c0_1 = arith.constant 0 : index
    %c0_2 = arith.constant 0 : index
    %0 = vector.load %arg3[%c0, %c0_0, %c0_1, %c0_2] : memref<1x2x8x32xf32, #tpu.memory_space<vmem>>, vector<1x2x8x32xf32>
    %1 = vector.shape_cast %0 : vector<1x2x8x32xf32> to vector<2x8x32xf32>
    %cst = arith.constant 0.176776692 : f32
    %2 = vector.broadcast %cst : f32 to vector<2x8x32xf32>
    %3 = arith.mulf %1, %2 : vector<2x8x32xf32>
    %4 = arith.truncf %3 : vector<2x8x32xf32> to vector<2x8x32xbf16>
    %c0_3 = arith.constant 0 : index
    %c0_4 = arith.constant 0 : index
    %c0_5 = arith.constant 0 : index
    %c0_6 = arith.constant 0 : index
    %5 = vector.load %arg4[%c0_3, %c0_4, %c0_5, %c0_6] : memref<1x2x8x32xf32, #tpu.memory_space<vmem>>, vector<1x2x8x32xf32>
    %6 = vector.shape_cast %5 : vector<1x2x8x32xf32> to vector<2x8x32xf32>
    %7 = arith.truncf %6 : vector<2x8x32xf32> to vector<2x8x32xbf16>
    %c0_7 = arith.constant 0 : index
    %c0_8 = arith.constant 0 : index
    %c0_9 = arith.constant 0 : index
    %c0_10 = arith.constant 0 : index
    %8 = vector.load %arg5[%c0_7, %c0_8, %c0_9, %c0_10] : memref<1x2x8x32xf32, #tpu.memory_space<vmem>>, vector<1x2x8x32xf32>
    %9 = vector.shape_cast %8 : vector<1x2x8x32xf32> to vector<2x8x32xf32>
    %10 = arith.truncf %9 : vector<2x8x32xf32> to vector<2x8x32xbf16>
    "tpu.trace_start"() <{level = 10 : i32, message = "hqd,hkd->hqk"}> : () -> ()
    %cst_11 = arith.constant dense<0.000000e+00> : vector<2x8x8xf32>
    %11 = tpu.matmul %4, %7, %cst_11 {dimension_numbers = #tpu.dot_dimension_numbers<[2], [2], [1], [1], [0, 0, 0, 1, 1, 1], [0], [0]>} : vector<2x8x32xbf16>, vector<2x8x32xbf16>, vector<2x8x8xf32> -> vector<2x8x8xf32>
    "tpu.trace_stop"() : () -> ()
    %c0_12 = arith.constant 0 : index
    %c0_13 = arith.constant 0 : index
    %c0_14 = arith.constant 0 : index
    %c0_15 = arith.constant 0 : index
    %12 = vector.load %arg6[%c0_12, %c0_13, %c0_14, %c0_15] : memref<1x1x1x8xi8, #tpu.memory_space<vmem>>, vector<1x1x1x8xi8>
    %13 = vector.shape_cast %12 : vector<1x1x1x8xi8> to vector<1x1x8xi8>
    %c0_i8 = arith.constant 0 : i8
    %14 = vector.broadcast %c0_i8 : i8 to vector<1x1x8xi8>
    %15 = arith.cmpi ne, %13, %14 : vector<1x1x8xi8>
    %16 = vector.shape_cast %15 : vector<1x1x8xi1> to vector<1x1x8xi1>
    %17 = vector.broadcast %16 : vector<1x1x8xi1> to vector<2x8x8xi1>
    %cst_16 = arith.constant -1.000000e+09 : f32
    %18 = vector.broadcast %cst_16 : f32 to vector<2x8x8xf32>
    %19 = arith.select %17, %18, %11 : vector<2x8x8xi1>, vector<2x8x8xf32>
    %cst_17 = arith.constant dense<0xFF800000> : vector<2x8xf32>
    %20 = vector.multi_reduction <maximumf>, %19, %cst_17 [2] : vector<2x8x8xf32> to vector<2x8xf32>
    %21 = vector.shape_cast %20 : vector<2x8xf32> to vector<2x8x1xf32>
    %22 = vector.broadcast %21 : vector<2x8x1xf32> to vector<2x8x8xf32>
    %23 = arith.subf %19, %22 : vector<2x8x8xf32>
    %24 = math.exp %23 : vector<2x8x8xf32>
    %cst_18 = arith.constant dense<0.000000e+00> : vector<2x8xf32>
    %25 = vector.multi_reduction <add>, %24, %cst_18 [2] : vector<2x8x8xf32> to vector<2x8xf32>
    %26 = vector.shape_cast %25 : vector<2x8xf32> to vector<2x8x1xf32>
    %27 = tpu.reciprocal %26 {approx = true} : vector<2x8x1xf32> -> vector<2x8x1xf32>
    %28 = vector.broadcast %27 : vector<2x8x1xf32> to vector<2x8x8xf32>
    %29 = arith.mulf %24, %28 : vector<2x8x8xf32>
    %30 = arith.truncf %29 : vector<2x8x8xf32> to vector<2x8x8xbf16>
    %c0_19 = arith.constant 0 : index
    %c0_20 = arith.constant 0 : index
    %c0_21 = arith.constant 0 : index
    %c0_22 = arith.constant 0 : index
    %31 = vector.load %arg8[%c0_19, %c0_20, %c0_21, %c0_22] : memref<1x2x8x8xbf16, #tpu.memory_space<vmem>>, vector<1x2x8x8xbf16>
    %32 = vector.shape_cast %31 : vector<1x2x8x8xbf16> to vector<2x8x8xbf16>
    %33 = vector.shape_cast %30 : vector<2x8x8xbf16> to vector<1x2x8x8xbf16>
    tpu.vector_store %arg8[%c0_19, %c0_20, %c0_21, %c0_22], %33 {strides = array<i32>} : memref<1x2x8x8xbf16, #tpu.memory_space<vmem>>, vector<1x2x8x8xbf16>,
    %34 = arith.truncf %29 : vector<2x8x8xf32> to vector<2x8x8xbf16>
    "tpu.trace_start"() <{level = 10 : i32, message = "hqk,hkd->hqd"}> : () -> ()
    %cst_23 = arith.constant dense<0.000000e+00> : vector<2x8x32xf32>
    %35 = tpu.matmul %34, %10, %cst_23 {dimension_numbers = #tpu.dot_dimension_numbers<[2], [1], [1], [2], [0, 0, 0, 1, 1, 2], [0], [0]>} : vector<2x8x8xbf16>, vector<2x8x32xbf16>, vector<2x8x32xf32> -> vector<2x8x32xf32>
    "tpu.trace_stop"() : () -> ()
    %c0_24 = arith.constant 0 : index
    %c0_25 = arith.constant 0 : index
    %c0_26 = arith.constant 0 : index
    %c0_27 = arith.constant 0 : index
    %36 = vector.load %arg7[%c0_24, %c0_25, %c0_26, %c0_27] : memref<1x2x8x32xf32, #tpu.memory_space<vmem>>, vector<1x2x8x32xf32>
    %37 = vector.shape_cast %36 : vector<1x2x8x32xf32> to vector<2x8x32xf32>
    %38 = vector.shape_cast %35 : vector<2x8x32xf32> to vector<1x2x8x32xf32>
    tpu.vector_store %arg7[%c0_24, %c0_25, %c0_26, %c0_27], %38 {strides = array<i32>} : memref<1x2x8x32xf32, #tpu.memory_space<vmem>>, vector<1x2x8x32xf32>,
    return
  }
  func.func @transform_0(%arg0: i32, %arg1: i32, %arg2: i32) -> (i32, i32, i32, i32) {
    %c0_i32 = arith.constant 0 : i32
    %c0_i32_0 = arith.constant 0 : i32
    return %arg0, %arg1, %arg2, %c0_i32 : i32, i32, i32, i32
  }
  func.func @transform_1(%arg0: i32, %arg1: i32, %arg2: i32) -> (i32, i32, i32, i32) {
    %c0_i32 = arith.constant 0 : i32
    %c0_i32_0 = arith.constant 0 : i32
    %c0_i32_1 = arith.constant 0 : i32
    return %arg0, %arg1, %c0_i32, %c0_i32_0 : i32, i32, i32, i32
  }
  func.func @transform_2(%arg0: i32, %arg1: i32, %arg2: i32) -> (i32, i32, i32, i32) {
    %c0_i32 = arith.constant 0 : i32
    %c0_i32_0 = arith.constant 0 : i32
    %c0_i32_1 = arith.constant 0 : i32
    return %arg0, %arg1, %c0_i32, %c0_i32_0 : i32, i32, i32, i32
  }
  func.func @transform_3(%arg0: i32, %arg1: i32, %arg2: i32) -> (i32, i32, i32, i32) {
    %c0_i32 = arith.constant 0 : i32
    %c0_i32_0 = arith.constant 0 : i32
    %c0_i32_1 = arith.constant 0 : i32
    %c0_i32_2 = arith.constant 0 : i32
    return %arg0, %c0_i32, %c0_i32_0, %c0_i32_1 : i32, i32, i32, i32
  }
  func.func @transform_4(%arg0: i32, %arg1: i32, %arg2: i32) -> (i32, i32, i32, i32) {
    %c0_i32 = arith.constant 0 : i32
    %c0_i32_0 = arith.constant 0 : i32
    return %arg0, %arg1, %arg2, %c0_i32 : i32, i32, i32, i32
  }
  func.func @transform_5(%arg0: i32, %arg1: i32, %arg2: i32) -> (i32, i32, i32, i32) {
    %c0_i32 = arith.constant 0 : i32
    %c0_i32_0 = arith.constant 0 : i32
    return %arg0, %arg1, %arg2, %c0_i32 : i32, i32, i32, i32
  }
}

</mosaic_0001>

<bundles_post_ra>
// kernel: tpu_custom_call.1
= control target key start
LH: loop header
LB: loop body
LE: loop exit
PB: predicated region body
PF: predicated region fallthrough
CT: control target
= control target key end

     0   :  { %s1335_s0 = inlined_call_operand.hbm [shape: f32[2,2,8,32], index: 0, kind: input, shape index: {}]   ;;  %s1336_s1 = inlined_call_operand.hbm [shape: f32[2,2,8,32], index: 1, kind: input, shape index: {}]   ;;  %s1337_s2 = inlined_call_operand.hbm [shape: f32[2,2,8,32], index: 2, kind: input, shape index: {}]   ;;  %s1338_s3 = inlined_call_operand.vmem [shape: s8[2,1,1,8], index: 3, kind: input, shape index: {}]   ;;  %s1339_s4 = inlined_call_operand.hbm [shape: f32[2,2,8,32], index: 4, kind: output, shape index: {0}]   ;;  %s1340_s5 = inlined_call_operand.hbm [shape: bf16[2,2,8,8], index: 5, kind: output, shape index: {1}]  }
   0x1   :  { %1348 = sst [smem:[#allocation22_spill]] %s1336_s1 }
   0x2   :  { %11 = vsyncpa [#allocation3], 0 }
   0x3   :  { %13 = vsyncpa [#allocation3 + $0x1], 0 }
   0x4   :  { %14 = vsyncpa [#allocation6], 0 }
   0x5   :  { %16 = vsyncpa [#allocation6 + $0x1], 0 }
   0x6   :  { %17 = vsyncpa [#allocation4], 0 }
   0x7   :  { %19 = vsyncpa [#allocation4 + $0x1], 0 }
   0x8   :  { %20 = vsyncpa [#allocation10], 0 }
   0x9   :  { %22 = vsyncpa [#allocation10 + $0x1], 0  ;;  %s1139_s18 = smov 0   ;;  %s1141_s19 = smov 0  }
   0xa   :  { %s1143_s20 = smov 0   ;;  %s1145_s21 = smov 0  }
   0xb   :  { %s1147_s22 = smov 0   ;;  %s1149_s23 = smov 0  }
   0xc LB: > { %1349 = sst [smem:[#allocation15_spill]] %s1080_s18  ;;  %s1170_s24 = sadd.s32 4294967295, %s1100_s23   ;;  %s1100_s23 = sphi %s1149_s23, %s28_s23   ;;  %s1096_s22 = sphi %s1147_s22, %s1369_s22   ;;  %s1092_s21 = sphi %s1145_s21, %s1368_s21   ;;  %s1088_s20 = sphi %s1143_s20, %s1367_s20   ;;  %s1084_s19 = sphi %s1141_s19, %s1371_s19   ;;  %s1080_s18 = sphi %s1139_s18, %s1370_s18  }
   0xd   : > { %1350 = sst [smem:[#allocation16_spill]] %s1088_s20  ;;  %s765_s25 = sadd.s32 4294967294, %s1100_s23  }
   0xe   : > { %1351 = sst [smem:[#allocation17_spill]] %s1096_s22  ;;  %s47_s26 = sadd.s32 1, %s1096_s22 }
   0xf   : > { %1352 = sst [smem:[#allocation18_spill]] %s1100_s23  ;;  %s58_s27 = sadd.s32 1, %s1088_s20 }
  0x10   : > { %p49_p0 = scmp.ge.s32.totalorder %s47_s26, 2  ;;  %p65_p1 = scmp.ne.s32.totalorder %s1088_s20, %s1084_s19 }
  0x11   : > { %p66_p2 = scmp.eq.s32.totalorder %s1100_s23, 0  ;;  %p71_p3 = scmp.ne.s32.totalorder %s1084_s19, %s1080_s18 }
  0x12   : > { %s1373_s26 = smov (%p49_p0, %s47_s26), 0  ;;  %p72_p5 = scmp.eq.s32.totalorder %s1170_s24, 0 }
  0x13   : > { %1353 = sst [smem:[#allocation19_spill]] %s1373_s26  ;;  %p1182_p4 = por %p66_p2, %p65_p1 }
  0x14   : > { %s51_s29 = ssub.s32 %s1096_s22, %s1373_s26  ;;  %p181_p6 = scmp.eq.s32.totalorder %s1170_s24, 1 }
  0x15   : > { %p56_p7 = scmp.eq.s32.totalorder %s51_s29, 0  ;;  %p1190_p8 = por %p72_p5, %p71_p3 }
  0x16   : > { %p1194_p9 = por %p181_p6, %p65_p1  ;;  %p187_p10 = scmp.eq.s32.totalorder %s765_s25, 1 }
  0x17   : > { %s1199_s7 = scalar_select %p56_p7, %s1088_s20, %s58_s27  }
  0x18   : > { %p1201_p11 = por %p187_p10, %p71_p3  ;;  %p767_p12 = scmp.ge.s32.totalorder %s1100_s23, 2 }
  0x19   : > { %1357 = sst [smem:[#allocation20_spill]] %s1199_s7  ;;  %p827_p13 = scmp.lt.s32.totalorder %s1100_s23, 2 }
  0x1a   : > { %s1358_s8 = scalar_select %p1201_p11, 1, 0 }
  0x1b   : > { %s237_s9 = sand.u32 1, %s1088_s20   ;;  %s795_s11 = sshll.u32 %s1096_s22, 4 }
  0x1c   : > { %1359 = sst [smem:[#allocation21_spill]] %s1358_s8  ;;  %s1208_s10 = sshll.u32 %s237_s9, 4 }
  0x1d   : > { %p1213_p0 = pnand %p827_p13, %p1182_p4  ;;  %s262_s13 = sand.u32 1, %s1100_s23  }
  0x1e   : > { %s1361_s1 = sld [smem:[#allocation22_spill]]  ;;  %s266_s25 = scalar_lea.vmem [#allocation5], %s1208_s10 }
  0x1f   : > { %s276_s27 = sshll.u32 %s266_s25, 4  ;;  %s263_s29 = scalar_lea.sflag [#allocation6], %s262_s13  ;;  %s277_s27 = int_to_ptr.vmem [resolvable:$true] %s276_s27 }
  0x20   : > { %s1102_s26 = smov 128   ;;  %s1103_s28 = smov 8  }
  0x21   : > { %p777_p1 = scmp.ge.s32.totalorder %s1100_s23, 1  ;;  %p314_p2 = scmp.lt.s32.totalorder %s1100_s23, 3 }
  0x22   : > { %s238_s13 = scalar_lea.sflag [#allocation3], %s237_s9  ;;  %s297_s20 = scalar_lea.hbm %s1337_s2, %s795_s11 }
  0x23   : > { %p1226_p3 = pnand %p777_p1, %p314_p2  ;;  %s298_s23 = sshll.u32 %s297_s20, 4  ;;  %s299_s23 = int_to_ptr.hbm [resolvable:$true] %s298_s23 }
  0x24   : > { %s273_s16 = scalar_lea.hbm %s1361_s1, %s795_s11  ;;  %s241_s1 = scalar_lea.vmem [#allocation2], %s1208_s10 }
  0x25   : > { %s274_s17 = sshll.u32 %s273_s16, 4  ;;  %s249_s16 = scalar_lea.hbm %s1335_s0, %s795_s11  ;;  %s275_s17 = int_to_ptr.hbm [resolvable:$true] %s274_s17 }
  0x26   : > { %816 = dma.hbm_to_vmem [thread:$0]  (!%p1213_p0), %s275_s17, 256, %s277_s27, %s263_s29, %s1102_s26, %s1102_s26, %s1103_s28  }
  0x27   : > { %s250_s25 = sshll.u32 %s249_s16, 4  ;;  %s252_s7 = sshll.u32 %s241_s1, 4  ;;  %s251_s25 = int_to_ptr.hbm [resolvable:$true] %s250_s25  ;;  %s253_s7 = int_to_ptr.vmem [resolvable:$true] %s252_s7 }
  0x28   : > { %813 = dma.hbm_to_vmem [thread:$0]  (!%p1213_p0), %s251_s25, 256, %s253_s7, %s238_s13, %s1102_s26, %s1102_s26, %s1103_s28  }
  0x29   : > { %s290_s8 = scalar_lea.vmem [#allocation7], %s1208_s10  ;;  %318 = sbr.rel (%p1226_p3) target bundleno = 592 (0x250), region = 36 }
  0x2a   : > { %s300_s18 = sshll.u32 %s290_s8, 4  ;;  %s1245_s1 = sand.u32 (!%p1226_p3), 1, %s1084_s19   ;;  %s301_s18 = int_to_ptr.vmem [resolvable:$true] %s300_s18 }
  0x2b   : > { %819 = dma.hbm_to_vmem [thread:$0]  (!%p1213_p0), %s299_s23, 256, %s301_s18, %s263_s29, %s1102_s26, %s1102_s26, %s1103_s28  }
  0x2c   : > { %s1248_s7 = sshll.u32 (!%p1226_p3), %s1245_s1, 4  ;;  %s321_s9 = scalar_lea.sflag (!%p1226_p3), [#allocation3], %s1245_s1 }
  0x2d   : > { %s324_s20 = scalar_lea.vmem (!%p1226_p3), [#allocation2], %s1248_s7 }
  0x2e   : > { %1063 = dma.done.wait (%p1190_p8), %s321_s9, 256  }
  0x2f   : > { %1065 = vsyncadd (%p1190_p8), %s321_s9, 4294967040  ;;  %s330_s18 = sand.u32 1, %s1170_s24   ;;  %s334_s23 = scalar_lea.vmem [#allocation5], %s1248_s7 }
  0x30   : > { %s331_s22 = scalar_lea.sflag [#allocation6], %s330_s18 }
  0x31   : > { %1067 = dma.done.wait (%p1190_p8), %s331_s22, 512  }
  0x32   : > { %1069 = vsyncadd (%p1190_p8), %s331_s22, 4294966784  ;;  %v407_v0 = vld [vmem:[%s334_s23] sm:$0xff]  ;;  %vm415_vm0 = vcmask 261120   ;;  %v408_v1 = vld [vmem:[%s334_s23 + $0x8] sm:$0xff]  ;;  %p393_p4 = scmp.lt.s32.totalorder %s1092_s21, 1  ;;  %v1104_v13 = vmov 0  }
  0x33   : > { %v401_v2 = vld [vmem:[%s324_s20] sm:$0xff]  ;;  %v409_v3 = vpack.c.bf16 %v407_v0, %v407_v0  ;;  %v410_v4 = vpack.c.bf16 %v408_v1, %v408_v1  ;;  %v402_v5 = vld [vmem:[%s324_s20 + $0x8] sm:$0xff]  ;;  %vm464_vm4 = vcmask 64512   ;;  %s344_s10 = scalar_lea.vmem [#allocation7], %s1248_s7  ;;  %vm495_vm5 = vcmask 1043456   ;;  %s782_s11 = sshll.u32 %s1245_s1, 3 }
  0x34   : > { %v403_v8 = vmul.f32 0.17677669, %v401_v2  ;;  %v404_v9 = vmul.f32 0.17677669, %v402_v5  ;;  %s394_s24 = scalar_select %p393_p4, %s1092_s21, 1  ;;  %v411_v36 = vld [vmem:[%s344_s10] sm:$0xff] }
  0x35   : > { %v420_v6 = vsel %vm415_vm0, %v409_v3, 0  ;;  %v439_v7 = vsel %vm415_vm0, %v410_v4, 0  ;;  %v413_v37 = vpack.c.bf16 %v411_v36, %v411_v36  ;;  %v412_v39 = vld [vmem:[%s344_s10 + $0x8] sm:$0xff]  ;;  %vm489_vm6 = vcmask 60416   ;;  %s389_s12 = scalar_lea.vmem [#allocation9], %s782_s11  ;;  %s799_s29 = sshll.u32 %s1092_s21, 3 }
  0x36   : > { %429 = vmatpush.bf16.xpose.msra.mxu0 %v420_v6  ;;  %448 = vmatpush.bf16.xpose.msra.mxu1 %v439_v7  ;;  %v405_v10 = vpack.c.bf16 %v403_v8, %v403_v8  ;;  %v406_v11 = vpack.c.bf16 %v404_v9, %v404_v9  ;;  %s395_s8 = scalar_lea.vmem %s1338_s3, %s394_s24  ;;  %v414_v40 = vpack.c.bf16 %v412_v39, %v412_v39  ;;  %s574_s28 = sshll.u32 %s389_s12, 4  ;;  %s575_s28 = int_to_ptr.vmem [resolvable:$true] %s574_s28 }
  0x37   : > { %v454_v12 = vld [vmem:[%s395_s8] sm:$0x1]  ;;  %v497_v38 = vsel %vm495_vm5, %v413_v37, 0  ;;  %s573_s16 = scalar_lea.hbm %s1340_s5, %s799_s29  ;;  %s539_s13 = scalar_lea.sflag [#allocation10], %s1245_s1 }
  0x38   : > { %vm455_vm1 = vnez %v454_v12  ;;  %506 = vmatpush.bf16.msra.mxu2 %v497_v38  ;;  %v516_v41 = vsel %vm495_vm5, %v414_v40, 0  ;;  %s576_s25 = sshll.u32 %s573_s16, 4  ;;  %s1002_s18 = scalar_lea.hbm %s1340_s5, 16  ;;  %s577_s25 = int_to_ptr.hbm [resolvable:$true] %s576_s25 }
  0x39   : > { %v456_v14 = vsel %vm455_vm1, 16843009, %v1104_v13  ;;  %525 = vmatpush.bf16.msra.mxu3 %v516_v41  ;;  %s996_s17 = sshra.s32 %s577_s25, 4  ;;  %s997_s17 = int_to_ptr.hbm [resolvable:$true] %s996_s17 }
  0x3a   : > { %v457_v15 = vunpack.c.0.s8 %v456_v14  ;;  %s998_s27 = scalar_lea.hbm %s997_s17, 8  ;;  %p1003_p8 = scmp.lt.s32.totalorder %s997_s17, %s1340_s5 }
  0x3b   : > { %p999_p5 = scmp.ne.s32.totalorder %s997_s17, %s998_s27  ;;  %p1004_p10 = scmp.lt.s32.totalorder %s1002_s18, %s998_s27 }
  0x3c   : > { %vm458_vm2 = vcmp.ne.s32.totalorder %v457_v15, 0 }
  0x3d   : > { %783 = vmatmul.msk.bf16.vlgmr.msra.gmra.mxu0 %vm415_vm0, %v405_v10  ;;  %784 = vmatmul.msk.bf16.vlgmr.msra.gmra.mxu1 %vm415_vm0, %v406_v11  ;;  %v459_v16 = vsel %vm458_vm2, 1, %v1104_v13  ;;  %p1000_p6 = pnand %p999_p5, %p1194_p9  ;;  %p1005_p13 = por %p1004_p10, %p1003_p8 }
  0x3e   : > { %v460_v17 = vperm.slane %v459_v16, 0 }
  0x3f   : > { %p1001_p7 = pneg %p1000_p6 }
  0x40   : > { %vm461_vm3 = vcmp.eq.s32.totalorder %v460_v17, 1 }
  0x41   : > { %p1006_p0 = pnand %p1005_p13, %p1001_p7 }
  0xba   : > { %v431_v18 = vpop.f32.mrf.mxu0  ;;  %v450_v19 = vpop.f32.mrf.mxu1 }
  0xbb   : > { %v462_v20 = vsel %vm461_vm3, -1e+09, %v431_v18  ;;  %v463_v22 = vsel %vm461_vm3, -1e+09, %v450_v19 }
  0xbc   : > { %v465_v21 = vsel %vm464_vm4, %v462_v20, -inf  ;;  %v468_v25 = vsel %vm464_vm4, %v463_v22, -inf }
  0xbd   : > { %466 = vmax.xlane.f32.xlu0 %v465_v21 }
  0xc2   : > { %v433_v23 = vpop.f32.mrf.mxu0  ;;  %v452_v24 = vpop.f32.mrf.mxu1 }
  0xc5   : > { %469 = vmax.xlane.f32.xlu0 %v468_v25 }
 0x130   : > { %v467_v26 = vpop.xlane.xlu0 %466 }
 0x131   : > { %v471_v27 = vsub.f32 %v462_v20, %v467_v26 }
 0x133   : > { %v473_v28 = vmul.f32 1.442695, %v471_v27 }
 0x135   : > { %884 = vpow2.f32 %v473_v28 }
 0x138   : > { %v470_v29 = vpop.xlane.xlu0 %469 }
 0x139   : > { %v472_v30 = vsub.f32 %v463_v22, %v470_v29 }
 0x13b   : > { %v885_v31 = vpop.eup %884  ;;  %v475_v32 = vmul.f32 1.442695, %v472_v30 }
 0x13c   : > { %v477_v33 = vsel %vm464_vm4, %v885_v31, 0.0 }
 0x13d   : > { %886 = vpow2.f32 %v475_v32  ;;  %478 = vadd.xlane.f32.xlu1 %v477_v33 }
 0x143   : > { %v887_v34 = vpop.eup %886 }
 0x144   : > { %v480_v35 = vsel %vm464_vm4, %v887_v34, 0.0 }
 0x145   : > { %481 = vadd.xlane.f32.xlu1 %v480_v35 }
 0x1b0   : > { %v479_v42 = vpop.xlane.xlu1 %478 }
 0x1b1   : > { %888 = vrcp.f32 %v479_v42 }
 0x1b7   : > { %v889_v43 = vpop.eup %888 }
 0x1b8   : > { %v482_v44 = vpop.xlane.xlu1 %481  ;;  %v485_v45 = vmul.f32 %v889_v43, %v885_v31 }
 0x1b9   : > { %890 = vrcp.f32 %v482_v44 }
 0x1ba   : > { %v487_v46 = vpack.c.bf16 %v485_v45, %v485_v45 }
 0x1bc   : > { %490 = vst.msk [vmem:[%s389_s12] sm:$0xf] %vm489_vm6, %v487_v46  ;;  %785 = vmatmul.msk.bf16.vlgmr.msra.gmra.mxu2 %vm464_vm4, %v487_v46 }
 0x1bf   : > { %v891_v47 = vpop.eup %890 }
 0x1c0   : > { %v486_v48 = vmul.f32 %v891_v47, %v887_v34 }
 0x1c2   : > { %v488_v49 = vpack.c.bf16 %v486_v48, %v486_v48 }
 0x1c4   : > { %491 = vst.msk [vmem:[%s389_s12 + $0x4] sm:$0xf] %vm489_vm6, %v488_v49  ;;  %786 = vmatmul.msk.bf16.vlgmr.msra.gmra.mxu3 %vm464_vm4, %v488_v49 }
 0x1c5   : > { %1009 = shalt.err (!%p1006_p0)
}
 0x1c6   : > { %s1105_s24 = smov 64   ;;  %s1106_s26 = smov 4  }
 0x1c7   : > { %807 = dma.vmem_to_hbm [thread:$0]  (%p1194_p9), %s575_s28, 128, %s577_s25, %s539_s13, %s1105_s24, %s1105_s24, %s1106_s26  }
 0x1c8   : > { %s798_s30 = sshll.u32 %s1092_s21, 4  ;;  %s382_s12 = scalar_lea.vmem [#allocation8], %s1248_s7 }
 0x1c9   : > { %s553_s11 = scalar_lea.hbm %s1339_s4, %s798_s30  ;;  %s554_s29 = sshll.u32 %s382_s12, 4  ;;  %s555_s29 = int_to_ptr.vmem [resolvable:$true] %s554_s29 }
 0x1ca   : > { %s556_s14 = sshll.u32 %s553_s11, 4  ;;  %s534_s15 = scalar_lea.sflag [#allocation4], %s1245_s1  ;;  %s557_s14 = int_to_ptr.hbm [resolvable:$true] %s556_s14 }
 0x1cb   : > { %s1024_s28 = sshra.s32 %s557_s14, 4  ;;  %s1030_s25 = scalar_lea.hbm %s1339_s4, 32  ;;  %s1025_s28 = int_to_ptr.hbm [resolvable:$true] %s1024_s28 }
 0x1cc   : > { %s1026_s21 = scalar_lea.hbm %s1025_s28, 16  ;;  %p1031_p4 = scmp.lt.s32.totalorder %s1025_s28, %s1339_s4 }
 0x1cd   : > { %p1027_p1 = scmp.ne.s32.totalorder %s1025_s28, %s1026_s21  ;;  %p1032_p5 = scmp.lt.s32.totalorder %s1030_s25, %s1026_s21 }
 0x1cf   : > { %p1028_p2 = pnand %p1027_p1, %p1194_p9  ;;  %p1033_p6 = por %p1032_p5, %p1031_p4 }
 0x1d1   : > { %p1029_p3 = pneg %p1028_p2 }
 0x1d3   : > { %p1034_p7 = pnand %p1033_p6, %p1029_p3 }
 0x23f   : > { %v508_v50 = vpop.f32.mrf.mxu2 }
 0x240   : > { %531 = vst.msk [vmem:[%s382_s12] sm:$0xff] %vm415_vm0, %v508_v50 }
 0x247   : > { %v510_v51 = vpop.f32.mrf.mxu2  ;;  %v527_v52 = vpop.f32.mrf.mxu3 }
 0x248   : > { %532 = vst.msk [vmem:[%s382_s12 + $0x8] sm:$0xff] %vm415_vm0, %v527_v52 }
 0x249   : > { %1037 = shalt.err (!%p1034_p7)
}
 0x24a   : > { %s1107_s1 = smov 128   ;;  %s1108_s27 = smov 8  }
 0x24b   : > { %806 = dma.vmem_to_hbm [thread:$0]  (%p1194_p9), %s555_s29, 256, %s557_s14, %s534_s15, %s1107_s1, %s1107_s1, %s1108_s27  }
 0x24f   : > { %v529_v53 = vpop.f32.mrf.mxu3 }
 0x250 PF: > { %s1363_s9 = sld [smem:[#allocation15_spill]]  ;;  %p821_p8 = pnand %p767_p12, %p1201_p11 }
 0x251   : > { %s1365_s18 = sld [smem:[#allocation18_spill]] }
 0x252   : > { %p822_p10 = pneg %p821_p8 }
 0x256   : > { %s591_s22 = sand.u32 1, %s1363_s9  }
 0x257   : > { %s592_s23 = scalar_lea.sflag [#allocation4], %s591_s22 }
 0x258   : > { %1071 = dma.done.wait (%p822_p10), %s592_s23, 256  }
 0x259   : > { %1073 = vsyncadd (%p822_p10), %s592_s23, 4294967040  ;;  %s602_s24 = scalar_lea.sflag [#allocation10], %s591_s22 }
 0x25a   : > { %1075 = dma.done.wait (%p822_p10), %s602_s24, 128  }
 0x25b   : > { %1077 = vsyncadd (%p822_p10), %s602_s24, 4294967168  ;;  %s28_s23 = sadd.s32 1, %s1365_s18   ;;  %s1366_s6 = sld [smem:[#allocation16_spill]] }
 0x25c   : > { %p25_p13 = scmp.ge.s32.totalorder %s28_s23, 4   ;;  %s1367_s20 = sld [smem:[#allocation20_spill]] }
 0x25d   : > { %s1368_s21 = sld [smem:[#allocation17_spill]]  ;;  %s1370_s18 = smov %s1084_s19 }
 0x25e   : > { %s1369_s22 = sld [smem:[#allocation19_spill]]  ;;  %27 = sbr.rel (!%p25_p13) target bundleno = 12 (0xc), region = 125 }
 0x261   : > { %s1371_s19 = smov %s1366_s6 }
 0x263   :  { %608 = vsyncpa [#allocation3], 1 }
 0x264   :  { %610 = vsyncpa [#allocation3 + $0x1], 1 }
 0x265   :  { %611 = vsyncpa [#allocation6], 1 }
 0x266   :  { %613 = vsyncpa [#allocation6 + $0x1], 1 }
 0x267   :  { %614 = vsyncpa [#allocation4], 1 }
 0x268   :  { %616 = vsyncpa [#allocation4 + $0x1], 1 }
 0x269   :  { %617 = vsyncpa [#allocation10], 1 }
 0x26a   :  { %619 = vsyncpa [#allocation10 + $0x1], 1 }

</bundles_post_ra>
